<compile_context>
chip_gen: v7x
topology: tpu7x:2x2x1
jax: 0.10.0
libtpu: 0.0.40
codegen_flags: <defaults>
</compile_context>

<pallas_src>
import functools
import math

import jax
import jax.numpy as jnp
from jax.experimental import pallas as pl
from jax.experimental.pallas import tpu as pltpu


def _round_up(a, b):
    return (a + b - 1) // b * b


# ------------------------------------------------------------------
# Pallas kernel (fully fused attention gate, NCHW-native, tiled over pixels)
# ------------------------------------------------------------------

def _attention_gate_kernel(g_ref, x_ref, wg_ref, wx_ref, shift_ref,
                           wpsi_ref, bpsi_ref, o_ref):
    """One (C, tp) pixel tile, pixels on the 128 lanes, channels on sublanes.

       p   = relu(Wg_f @ g + Wx_f @ x + shift)   # BN scales folded into Wg/Wx
       psi = sigmoid(sum_c wpsi[c] * p[c] + b)   # Cout==1 head: sublane reduce
       o   = x * psi
    """
    g = g_ref[...]                                                # (F_g, tp) bf16
    x = x_ref[...]                                                # (F_l, tp) bf16

    # Gate GEMMs on the MXU (bf16 operands, f32 accumulation).
    g1 = jnp.dot(wg_ref[...], g, preferred_element_type=jnp.float32)   # (F_int, tp)
    x1 = jnp.dot(wx_ref[...], x, preferred_element_type=jnp.float32)   # (F_int, tp)

    # Combined folded-BN shift + ReLU (VPU, f32).
    p = jnp.maximum(g1 + x1 + shift_ref[...], 0.0)                # (F_int, tp)

    # psi head (Cout == 1): BN-folded weights, reduce over the F_int sublanes.
    z = jnp.sum(p * wpsi_ref[...], axis=0, keepdims=True) + bpsi_ref[...]  # (1, tp)
    psi = jax.nn.sigmoid(z)

    # Lane-dense store: tp is a multiple of 128.
    o_ref[...] = (x.astype(jnp.float32) * psi).astype(o_ref.dtype)


# ------------------------------------------------------------------
# Wrapper
# ------------------------------------------------------------------

def _pick_pixel_tile(HW, N, F_g, F_l, in_bytes, out_bytes,
                     target_tp, vmem_budget_bytes):
    """Biggest 128-multiple pixel tile that fits the VMEM budget, while keeping
    the parallel grid >= 2 so both v7x TensorCores get work."""
    # double-buffered streamed bytes per pixel column (g + x in, out)
    per_col = 2 * (F_g * in_bytes + F_l * in_bytes + F_l * out_bytes)
    tp_cap = max(128, (vmem_budget_bytes // per_col) // 128 * 128)
    tp = min(target_tp, tp_cap, _round_up(HW, 128))
    if N * pl.cdiv(HW, tp) < 2 and HW > 128:
        tp = _round_up(pl.cdiv(HW, 2), 128)
    return tp, per_col


def attention_block(params, g, x, *, target_tp=2048,
                    compute_dtype=jnp.bfloat16, out_dtype=None,
                    vmem_budget_bytes=24 << 20):
    """g: (N, F_g, H, W), x: (N, F_l, H, W)  (NCHW, like PyTorch)."""
    N, F_g, H, W = g.shape
    Nx, F_l, Hx, Wx = x.shape
    assert (N, H, W) == (Nx, Hx, Wx)
    F_int = params["wg"].shape[1]
    HW = H * W
    out_dtype = out_dtype or x.dtype

    in_bytes = jnp.dtype(compute_dtype).itemsize
    out_bytes = jnp.dtype(out_dtype).itemsize
    tp, per_col = _pick_pixel_tile(HW, N, F_g, F_l, in_bytes, out_bytes,
                                   target_tp, vmem_budget_bytes)
    HW_pad = _round_up(HW, tp)

    # NCHW-native: merge H*W (free reshape, no transpose); stream in bf16.
    g3 = g.reshape(N, F_g, HW).astype(compute_dtype)
    x3 = x.reshape(N, F_l, HW).astype(compute_dtype)
    if HW_pad != HW:
        # padded pixel columns give out = 0 * psi = 0 and are sliced off below
        g3 = jnp.pad(g3, ((0, 0), (0, 0), (0, HW_pad - HW)))
        x3 = jnp.pad(x3, ((0, 0), (0, 0), (0, HW_pad - HW)))

    # Fold BN scales into the (transposed) gate weights in f32, then cast to
    # bf16 for the MXU.  Shifts combine into one per-channel column.
    wg_t = (params["scale_g"][:, None] * params["wg"].T).astype(compute_dtype)  # (F_int, F_g)
    wx_t = (params["scale_x"][:, None] * params["wx"].T).astype(compute_dtype)  # (F_int, F_l)
    shift = (params["shift_g"] + params["shift_x"]).reshape(F_int, 1).astype(jnp.float32)
    wpsi = params["w_psi"].reshape(F_int, 1).astype(jnp.float32)                # BN-folded
    bpsi = params["b_psi"].reshape(1, 1).astype(jnp.float32)

    grid = (N, HW_pad // tp)
    vmem_need = per_col * tp + 2 * (wg_t.size + wx_t.size) * in_bytes + (1 << 20)
    vmem_limit = int(min(48 << 20, max(32 << 20, vmem_need)))   # v7x-safe ceiling

    out3 = pl.pallas_call(
        _attention_gate_kernel,
        out_shape=jax.ShapeDtypeStruct((N, F_l, HW_pad), out_dtype),
        grid=grid,
        in_specs=[
            pl.BlockSpec((None, F_g, tp), lambda n, j: (n, 0, j)),   # g tile
            pl.BlockSpec((None, F_l, tp), lambda n, j: (n, 0, j)),   # x tile
            pl.BlockSpec((F_int, F_g), lambda n, j: (0, 0)),         # W_g^T (folded, bf16)
            pl.BlockSpec((F_int, F_l), lambda n, j: (0, 0)),         # W_x^T (folded, bf16)
            pl.BlockSpec((F_int, 1), lambda n, j: (0, 0)),           # combined shift
            pl.BlockSpec((F_int, 1), lambda n, j: (0, 0)),           # w_psi (BN-folded)
            pl.BlockSpec((1, 1), lambda n, j: (0, 0)),               # b_psi
        ],
        out_specs=pl.BlockSpec((None, F_l, tp), lambda n, j: (n, 0, j)),
        compiler_params=pltpu.CompilerParams(
            dimension_semantics=("parallel", "parallel"),
            vmem_limit_bytes=vmem_limit,
        ),
    )(g3, x3, wg_t, wx_t, shift, wpsi, bpsi)

    if HW_pad != HW:
        out3 = out3[:, :, :HW]
    return out3.reshape(N, F_l, H, W)


# ------------------------------------------------------------------
# Pure-JAX reference (f32 everywhere) for a semantics check
# ------------------------------------------------------------------

def attention_block_ref(params, g, x):
    gn = jnp.transpose(g, (0, 2, 3, 1))
    xn = jnp.transpose(x, (0, 2, 3, 1))
    g1 = gn @ params["wg"] * params["scale_g"] + params["shift_g"]
    x1 = xn @ params["wx"] * params["scale_x"] + params["shift_x"]
    p = jnp.maximum(g1 + x1, 0.0)
    z = jnp.sum(p * params["w_psi"], axis=-1, keepdims=True) + params["b_psi"]
    psi = jax.nn.sigmoid(z)
    return jnp.transpose(xn * psi, (0, 3, 1, 2))


# ------------------------------------------------------------------
# Parameter init (deterministic, PyTorch-default-like magnitudes),
# with inference-mode BN folded into scale/shift.
# ------------------------------------------------------------------

def _init_conv1x1_bn(key, cin, cout, eps=1e-5):
    kw, kb, kg, kbe, km, kv = jax.random.split(key, 6)
    bound = 1.0 / math.sqrt(cin)
    w = jax.random.uniform(kw, (cin, cout), jnp.float32, -bound, bound)
    b = jax.random.uniform(kb, (cout,), jnp.float32, -bound, bound)
    gamma = 1.0 + 0.1 * jax.random.normal(kg, (cout,), jnp.float32)
    beta = 0.1 * jax.random.normal(kbe, (cout,), jnp.float32)
    mean = 0.1 * jax.random.normal(km, (cout,), jnp.float32)
    var = 1.0 + 0.1 * jax.random.uniform(kv, (cout,), jnp.float32)
    scale = gamma / jnp.sqrt(var + eps)             # BN scale
    shift = (b - mean) * scale + beta               # conv bias + BN folded
    return w, scale, shift


def init_attention_block(key, F_g, F_l, F_int):
    k1, k2, k3 = jax.random.split(key, 3)
    wg, sg, bg = _init_conv1x1_bn(k1, F_g, F_int)
    wx, sx, bx = _init_conv1x1_bn(k2, F_l, F_int)
    wpsi, spsi, bpsi = _init_conv1x1_bn(k3, F_int, 1)
    # Fold psi's BN scale into its 1-channel weight; shift stays a scalar.
    w_psi = wpsi[:, 0] * spsi[0]                    # (F_int,)
    b_psi = bpsi[0]                                 # scalar
    return {
        "wg": wg, "scale_g": sg, "shift_g": bg,
        "wx": wx, "scale_x": sx, "shift_x": bx,
        "w_psi": w_psi, "b_psi": b_psi,
    }


# ------------------------------------------------------------------

if __name__ == "__main__":
    key = jax.random.PRNGKey(0)
    kp, kg, kx = jax.random.split(key, 3)

    F_g, F_l, F_int = 64, 64, 32
    N, H, W = 2, 16, 16

    params = init_attention_block(kp, F_g, F_l, F_int)
    g = jax.random.normal(kg, (N, F_g, H, W), jnp.float32)
    x = jax.random.normal(kx, (N, F_l, H, W), jnp.float32)

    fwd = jax.jit(functools.partial(attention_block, params))
    out = jax.block_until_ready(fwd(g, x))

    ref = attention_block_ref(params, g, x)

    assert out.shape == (N, F_l, H, W), out.shape
    assert out.dtype == jnp.float32
    assert bool(jnp.all(jnp.isfinite(out)))
    # bf16 activations/weights on the MXU path vs f32 reference -> loose tolerance.
    assert bool(jnp.allclose(out, ref, atol=5e-2, rtol=5e-2))
    print("KERNEL_OK")
</pallas_src>

<mosaic_0001>
module attributes {stable_mosaic.version = 11 : i64} {
  func.func @_attention_gate_kernel(%arg0: i32, %arg1: i32, %arg2: memref<1x64x256xbf16, #tpu.memory_space<vmem>>, %arg3: memref<1x64x256xbf16, #tpu.memory_space<vmem>>, %arg4: memref<32x64xbf16, #tpu.memory_space<vmem>>, %arg5: memref<32x64xbf16, #tpu.memory_space<vmem>>, %arg6: memref<32x1xf32, #tpu.memory_space<vmem>>, %arg7: memref<32x1xf32, #tpu.memory_space<vmem>>, %arg8: memref<1x1xf32, #tpu.memory_space<vmem>>, %arg9: memref<1x64x256xf32, #tpu.memory_space<vmem>>) attributes {dimension_semantics = [#tpu.dimension_semantics<parallel>, #tpu.dimension_semantics<parallel>], iteration_bounds = array<i64: 2, 1>, scalar_prefetch = 0 : i64, scratch_operands = 0 : i64, tpu.core_type = #tpu.core_type<tc>, window_params = [{transform_indices = @transform_0, window_bounds = array<i64: 1, 64, 256>}, {transform_indices = @transform_1, window_bounds = array<i64: 1, 64, 256>}, {pipeline_mode = #tpu.pipeline_mode<synchronous>, transform_indices = @transform_2, window_bounds = array<i64: 32, 64>}, {pipeline_mode = #tpu.pipeline_mode<synchronous>, transform_indices = @transform_3, window_bounds = array<i64: 32, 64>}, {pipeline_mode = #tpu.pipeline_mode<synchronous>, transform_indices = @transform_4, window_bounds = array<i64: 32, 1>}, {pipeline_mode = #tpu.pipeline_mode<synchronous>, transform_indices = @transform_5, window_bounds = array<i64: 32, 1>}, {pipeline_mode = #tpu.pipeline_mode<synchronous>, transform_indices = @transform_6, window_bounds = array<i64: 1, 1>}, {transform_indices = @transform_7, window_bounds = array<i64: 1, 64, 256>}]} {
    %c0 = arith.constant 0 : index
    %c0_0 = arith.constant 0 : index
    %c0_1 = arith.constant 0 : index
    %0 = vector.load %arg2[%c0, %c0_0, %c0_1] : memref<1x64x256xbf16, #tpu.memory_space<vmem>>, vector<1x64x256xbf16>
    %1 = vector.shape_cast %0 : vector<1x64x256xbf16> to vector<64x256xbf16>
    %c0_2 = arith.constant 0 : index
    %c0_3 = arith.constant 0 : index
    %c0_4 = arith.constant 0 : index
    %2 = vector.load %arg3[%c0_2, %c0_3, %c0_4] : memref<1x64x256xbf16, #tpu.memory_space<vmem>>, vector<1x64x256xbf16>
    %3 = vector.shape_cast %2 : vector<1x64x256xbf16> to vector<64x256xbf16>
    %c0_5 = arith.constant 0 : index
    %c0_6 = arith.constant 0 : index
    %4 = vector.load %arg4[%c0_5, %c0_6] : memref<32x64xbf16, #tpu.memory_space<vmem>>, vector<32x64xbf16>
    %cst = arith.constant dense<0.000000e+00> : vector<32x256xf32>
    %5 = tpu.matmul %4, %1, %cst {dimension_numbers = #tpu.dot_dimension_numbers<[1], [0], [0], [1], [0, 0, 1, 1], [], []>} : vector<32x64xbf16>, vector<64x256xbf16>, vector<32x256xf32> -> vector<32x256xf32>
    %c0_7 = arith.constant 0 : index
    %c0_8 = arith.constant 0 : index
    %6 = vector.load %arg5[%c0_7, %c0_8] : memref<32x64xbf16, #tpu.memory_space<vmem>>, vector<32x64xbf16>
    %cst_9 = arith.constant dense<0.000000e+00> : vector<32x256xf32>
    %7 = tpu.matmul %6, %3, %cst_9 {dimension_numbers = #tpu.dot_dimension_numbers<[1], [0], [0], [1], [0, 0, 1, 1], [], []>} : vector<32x64xbf16>, vector<64x256xbf16>, vector<32x256xf32> -> vector<32x256xf32>
    %8 = arith.addf %5, %7 : vector<32x256xf32>
    %c0_10 = arith.constant 0 : index
    %c0_11 = arith.constant 0 : index
    %9 = vector.load %arg6[%c0_10, %c0_11] : memref<32x1xf32, #tpu.memory_space<vmem>>, vector<32x1xf32>
    %10 = vector.broadcast %9 : vector<32x1xf32> to vector<32x256xf32>
    %11 = arith.addf %8, %10 : vector<32x256xf32>
    %cst_12 = arith.constant 0.000000e+00 : f32
    %12 = vector.broadcast %cst_12 : f32 to vector<32x256xf32>
    %13 = arith.maximumf %11, %12 : vector<32x256xf32>
    %c0_13 = arith.constant 0 : index
    %c0_14 = arith.constant 0 : index
    %14 = vector.load %arg7[%c0_13, %c0_14] : memref<32x1xf32, #tpu.memory_space<vmem>>, vector<32x1xf32>
    %15 = vector.broadcast %14 : vector<32x1xf32> to vector<32x256xf32>
    %16 = arith.mulf %13, %15 : vector<32x256xf32>
    %cst_15 = arith.constant dense<0.000000e+00> : vector<256xf32>
    %17 = vector.multi_reduction <add>, %16, %cst_15 [0] : vector<32x256xf32> to vector<256xf32>
    %18 = vector.shape_cast %17 : vector<256xf32> to vector<1x256xf32>
    %c0_16 = arith.constant 0 : index
    %c0_17 = arith.constant 0 : index
    %19 = vector.load %arg8[%c0_16, %c0_17] : memref<1x1xf32, #tpu.memory_space<vmem>>, vector<1x1xf32>
    %20 = vector.broadcast %19 : vector<1x1xf32> to vector<1x256xf32>
    %21 = arith.addf %18, %20 : vector<1x256xf32>
    %22 = arith.negf %21 : vector<1x256xf32>
    %23 = math.exp %22 : vector<1x256xf32>
    %cst_18 = arith.constant 1.000000e+00 : f32
    %24 = vector.broadcast %cst_18 : f32 to vector<1x256xf32>
    %25 = arith.addf %24, %23 : vector<1x256xf32>
    %26 = arith.divf %24, %25 : vector<1x256xf32>
    %27 = arith.extf %3 : vector<64x256xbf16> to vector<64x256xf32>
    %28 = vector.broadcast %26 : vector<1x256xf32> to vector<64x256xf32>
    %29 = arith.mulf %27, %28 : vector<64x256xf32>
    %c0_19 = arith.constant 0 : index
    %c0_20 = arith.constant 0 : index
    %c0_21 = arith.constant 0 : index
    %30 = vector.load %arg9[%c0_19, %c0_20, %c0_21] : memref<1x64x256xf32, #tpu.memory_space<vmem>>, vector<1x64x256xf32>
    %31 = vector.shape_cast %30 : vector<1x64x256xf32> to vector<64x256xf32>
    %32 = vector.shape_cast %29 : vector<64x256xf32> to vector<1x64x256xf32>
    tpu.vector_store %arg9[%c0_19, %c0_20, %c0_21], %32 {strides = array<i32>} : memref<1x64x256xf32, #tpu.memory_space<vmem>>, vector<1x64x256xf32>,
    return
  }
  func.func @transform_0(%arg0: i32, %arg1: i32) -> (i32, i32, i32) {
    %c0_i32 = arith.constant 0 : i32
    %c0_i32_0 = arith.constant 0 : i32
    return %arg0, %c0_i32, %arg1 : i32, i32, i32
  }
  func.func @transform_1(%arg0: i32, %arg1: i32) -> (i32, i32, i32) {
    %c0_i32 = arith.constant 0 : i32
    %c0_i32_0 = arith.constant 0 : i32
    return %arg0, %c0_i32, %arg1 : i32, i32, i32
  }
  func.func @transform_2(%arg0: i32, %arg1: i32) -> (i32, i32) {
    %c0_i32 = arith.constant 0 : i32
    %c0_i32_0 = arith.constant 0 : i32
    %c0_i32_1 = arith.constant 0 : i32
    return %c0_i32, %c0_i32_0 : i32, i32
  }
  func.func @transform_3(%arg0: i32, %arg1: i32) -> (i32, i32) {
    %c0_i32 = arith.constant 0 : i32
    %c0_i32_0 = arith.constant 0 : i32
    %c0_i32_1 = arith.constant 0 : i32
    return %c0_i32, %c0_i32_0 : i32, i32
  }
  func.func @transform_4(%arg0: i32, %arg1: i32) -> (i32, i32) {
    %c0_i32 = arith.constant 0 : i32
    %c0_i32_0 = arith.constant 0 : i32
    %c0_i32_1 = arith.constant 0 : i32
    return %c0_i32, %c0_i32_0 : i32, i32
  }
  func.func @transform_5(%arg0: i32, %arg1: i32) -> (i32, i32) {
    %c0_i32 = arith.constant 0 : i32
    %c0_i32_0 = arith.constant 0 : i32
    %c0_i32_1 = arith.constant 0 : i32
    return %c0_i32, %c0_i32_0 : i32, i32
  }
  func.func @transform_6(%arg0: i32, %arg1: i32) -> (i32, i32) {
    %c0_i32 = arith.constant 0 : i32
    %c0_i32_0 = arith.constant 0 : i32
    %c0_i32_1 = arith.constant 0 : i32
    return %c0_i32, %c0_i32_0 : i32, i32
  }
  func.func @transform_7(%arg0: i32, %arg1: i32) -> (i32, i32, i32) {
    %c0_i32 = arith.constant 0 : i32
    %c0_i32_0 = arith.constant 0 : i32
    return %arg0, %c0_i32, %arg1 : i32, i32, i32
  }
}

</mosaic_0001>

<bundles_post_ra>
// kernel: attention_block.1
= control target key start
LH: loop header
LB: loop body
LE: loop exit
PB: predicated region body
PF: predicated region fallthrough
CT: control target
= control target key end

     0   :  { %s1044_s26 = smov 0   ;;  %s1046_s27 = smov 0   ;;  %s1202_s0 = inlined_call_operand.vmem [shape: bf16[2,64,256], index: 0, kind: input, shape index: {}]   ;;  %s1203_s1 = inlined_call_operand.vmem [shape: bf16[2,64,256], index: 1, kind: input, shape index: {}]   ;;  %s1204_s2 = inlined_call_operand.vmem [shape: bf16[32,64], index: 2, kind: input, shape index: {}]   ;;  %s1205_s3 = inlined_call_operand.vmem [shape: bf16[32,64], index: 3, kind: input, shape index: {}]   ;;  %s1206_s4 = inlined_call_operand.vmem [shape: f32[32,1], index: 4, kind: input, shape index: {}]   ;;  %s1207_s5 = inlined_call_operand.vmem [shape: f32[32,1], index: 5, kind: input, shape index: {}]   ;;  %s1208_s6 = inlined_call_operand.<no memory space> [shape: f32[1,1], index: 6, kind: input, shape index: {}]   ;;  %s1209_s7 = inlined_call_operand.vmem [shape: f32[2,64,256], index: 7, kind: output, shape index: {}]  }
   0x1   :  { %v12_v0 = vstv %s1208_s6  ;;  %s1048_s28 = smov 0  }
   0x2   :  { %13 = vst [vmem:[#allocation2] sm:$0x1] %v12_v0 }
   0x3 LB: > { %s31_s6 = sadd.s32 1, %s994_s27  ;;  %p871_p0 = scmp.ge.s32.totalorder %s998_s28, 1  ;;  %s998_s28 = sphi %s1048_s28, %s19_s28   ;;  %s994_s27 = sphi %s1046_s27, %s1211_s27   ;;  %s990_s26 = sphi %s1044_s26, %s1210_s26  }
   0x4   : > { %p33_p1 = scmp.ge.s32.totalorder %s31_s6, 2  ;;  %p277_p2 = scmp.lt.s32.totalorder %s998_s28, 3 }
   0x6   : > { %s1213_s6 = smov (%p33_p1, %s31_s6), 0  ;;  %p278_p3 = pnand %p871_p0, %p277_p2 }
   0x7   : > { %p327_p4 = scmp.lt.s32.totalorder (!%p278_p3), %s990_s26, 1  ;;  %v1000_v1 = vmov (!%p278_p3), 0   ;;  %v600_v2 = vld [vmem:[%s1206_s4] sm:$0xff] (!%p278_p3)  ;;  %v602_v3 = vld [vmem:[%s1206_s4 + $0x10] sm:$0xff] (!%p278_p3)  ;;  %v601_v9 = vld [vmem:[%s1206_s4 + $0x8] sm:$0xff] (!%p278_p3)  ;;  %vm431_vm0 = vcmask (!%p278_p3), 523264  }
   0x8   : > { %281 = sbr.rel (%p278_p3) target bundleno = 319 (0x13f), region = 48  ;;  %470 = vmatprep.mubr.bf16.mxu1 (!%p278_p3), %v1000_v1  ;;  %579 = vmatprep.mubr.bf16.mxu0 (!%p278_p3), %v1000_v1  ;;  %v603_v10 = vld [vmem:[%s1206_s4 + $0x18] sm:$0xff] (!%p278_p3)  ;;  %v640_v24 = vld [vmem:[%s1207_s5] sm:$0xff] (!%p278_p3)  ;;  %v641_v27 = vld [vmem:[%s1207_s5 + $0x8] sm:$0xff] (!%p278_p3) }
   0x9   : > { %942 = vset.pattern.permute.xlu0 (!%p278_p3), %v1000_v1  ;;  %943 = vset.pattern.permute.xlu1 (!%p278_p3), %v1000_v1  ;;  %v642_v30 = vld [vmem:[%s1207_s5 + $0x10] sm:$0xff] (!%p278_p3)  ;;  %v643_v31 = vld [vmem:[%s1207_s5 + $0x18] sm:$0xff] (!%p278_p3)  ;;  %v964_v34 = vld [vmem:[%s1205_s3] sm:$0xff] (!%p278_p3)  }
   0xa   : > { %606 = vperm.xlu0 (!%p278_p3), %942, %v600_v2   ;;  %616 = vperm.xlu1 (!%p278_p3), %943, %v602_v3   ;;  %v965_v35 = vld [vmem:[%s1204_s2] sm:$0xff] (!%p278_p3)   ;;  %v966_v37 = vld [vmem:[%s1205_s3 + $0x8] sm:$0xff] (!%p278_p3)  }
   0xb   : > { %v690_v36 = vld [vmem:[#allocation2] sm:$0x1] (!%p278_p3)  ;;  %v967_v38 = vld [vmem:[%s1204_s2 + $0x8] sm:$0xff] (!%p278_p3)  }
   0xe   : > { %611 = vperm.xlu0 (!%p278_p3), %942, %v601_v9   ;;  %621 = vperm.xlu1 (!%p278_p3), %943, %v603_v10  }
   0xf   : > { %s1215_s26 = smov (!%p327_p4, %s990_s26), 1 }
  0x10   : > { %s906_s29 = sshll.u32 %s1215_s26, 6  ;;  %s908_s17 = sshll.u32 %s1215_s26, 7 }
  0x11   : > { %s344_s11 = scalar_lea.vmem %s1203_s1, %s906_s29  ;;  %s1085_s16 = scalar_lea.vmem %s1202_s0, %s906_s29 }
  0x12   : > { %v1078_v4 = vld [vmem:[%s344_s11] sm:$0xff]  ;;  %v1080_v5 = vld [vmem:[%s344_s11 + $0x8] sm:$0xff]  ;;  %v1087_v6 = vld [vmem:[%s344_s11 + $0x10] sm:$0xff]  ;;  %646 = vperm.xlu0 %942, %v640_v24   ;;  %651 = vperm.xlu1 %943, %v641_v27   ;;  %s1171_s19 = scalar_lea.vmem %s1209_s7, %s908_s17 }
  0x13   : > { %v881_v7 = vcombine.high %v1078_v4, %v1080_v5  ;;  %v945_v8 = vld [vmem:[%s1085_s16 + $0x4] ss:$8 sps:$4 sm:$0xff]   ;;  %v880_v11 = vcombine.low %v1078_v4, %v1080_v5  ;;  %v948_v12 = vld [vmem:[%s1085_s16] ss:$8 sps:$4 sm:$0xff]   ;;  %v1101_v13 = vld [vmem:[%s344_s11 + $0x18] sm:$0xff] }
  0x14   : > { %547 = vmatprep.subr.bf16.mxu0 %v945_v8  ;;  %v883_v14 = vcombine.high %v1087_v6, %v1101_v13  ;;  %v950_v15 = vld [vmem:[%s1085_s16 + $0x14] ss:$8 sps:$4 sm:$0xff]   ;;  %v953_v16 = vld [vmem:[%s1085_s16 + $0x10] ss:$8 sps:$4 sm:$0xff]   ;;  %v882_v17 = vcombine.low %v1087_v6, %v1101_v13  ;;  %v1109_v18 = vld [vmem:[%s344_s11 + $0x20] sm:$0xff] }
  0x15   : > { %438 = vmatprep.subr.bf16.mxu1 %v881_v7  ;;  %548 = vmatpush1.bf16.msra.mxu0 %v948_v12  ;;  %v1111_v19 = vld [vmem:[%s344_s11 + $0x28] sm:$0xff]  ;;  %v1116_v22 = vld [vmem:[%s344_s11 + $0x30] sm:$0xff]  ;;  %v1118_v23 = vld [vmem:[%s344_s11 + $0x38] sm:$0xff] }
  0x16   : > { %439 = vmatpush1.bf16.msra.mxu1 %v880_v11  ;;  %549 = vmatprep.subr.bf16.mxu0 %v950_v15  ;;  %v885_v20 = vcombine.high %v1109_v18, %v1111_v19  ;;  %v955_v21 = vld [vmem:[%s1085_s16 + $0x24] ss:$8 sps:$4 sm:$0xff]   ;;  %v884_v25 = vcombine.low %v1109_v18, %v1111_v19  ;;  %v958_v26 = vld [vmem:[%s1085_s16 + $0x20] ss:$8 sps:$4 sm:$0xff]   ;;  %v887_v28 = vcombine.high %v1116_v22, %v1118_v23  ;;  %v960_v29 = vld [vmem:[%s1085_s16 + $0x34] ss:$8 sps:$4 sm:$0xff]  }
  0x17   : > { %440 = vmatprep.subr.bf16.mxu1 %v883_v14  ;;  %v886_v32 = vcombine.low %v1116_v22, %v1118_v23  ;;  %v963_v33 = vld [vmem:[%s1085_s16 + $0x30] ss:$8 sps:$4 sm:$0xff]   ;;  %656 = vperm.xlu0 %942, %v642_v30  }
  0x18   : > { %661 = vperm.xlu1 %943, %v643_v31  }
  0x19   : > { %550 = vmatpush1.bf16.msra.mxu0 %v953_v16 }
  0x1a   : > { %441 = vmatpush1.bf16.msra.mxu1 %v882_v17  ;;  %551 = vmatprep.subr.bf16.mxu0 %v955_v21 }
  0x1b   : > { %442 = vmatprep.subr.bf16.mxu1 %v885_v20  ;;  %693 = vperm.xlu0 %942, %v690_v36  }
  0x1d   : > { %552 = vmatpush1.bf16.msra.mxu0 %v958_v26 }
  0x1e   : > { %443 = vmatpush1.bf16.msra.mxu1 %v884_v25  ;;  %553 = vmatprep.subr.bf16.mxu0 %v960_v29 }
  0x1f   : > { %444 = vmatprep.subr.bf16.mxu1 %v887_v28 }
  0x21   : > { %554 = vmatpush1.bf16.msra.mxu0 %v963_v33 }
  0x22   : > { %445 = vmatpush1.bf16.msra.mxu1 %v886_v32 }
  0x24   : > { %900 = vmatmul.mubr.msk.bf16.vlgmr.msra.gmra.mrb[0].mxu0 %vm431_vm0, %v965_v35 }
  0x25   : > { %888 = vmatmul.mubr.msk.bf16.vlgmr.msra.gmra.mrb[0].mxu1 %vm431_vm0, %v964_v34  ;;  %589 = vmatprep.mubr.bf16.mxu0 %v1000_v1 }
  0x26   : > { %480 = vmatprep.mubr.bf16.mxu1 %v1000_v1 }
  0x2c   : > { %901 = vmatmul.mubr.msk.bf16.gmra.mrb[4].mxu0 %vm431_vm0, %v967_v38 }
  0x2d   : > { %889 = vmatmul.mubr.msk.bf16.gmra.mrb[4].mxu1 %vm431_vm0, %v966_v37 }
  0x89   : > { %v607_v39 = vpop.permute.xlu0 %606  ;;  %v617_v40 = vpop.permute.xlu1 %616 }
  0x8d   : > { %v612_v41 = vpop.permute.xlu0 %611  ;;  %v622_v42 = vpop.permute.xlu1 %621 }
  0x91   : > { %v647_v61 = vpop.permute.xlu0 %646  ;;  %v652_v62 = vpop.permute.xlu1 %651 }
  0x96   : > { %v657_v31 = vpop.permute.xlu0 %656 }
  0x97   : > { %v662_v36 = vpop.permute.xlu1 %661 }
  0xf7   : > { %v581_v44 = vpop.f32.mrb[0].mxu0 }
  0xf8   : > { %v472_v43 = vpop.f32.mrb[0].mxu1  ;;  %v583_v47 = vpop.f32.mrb[1].mxu0 }
  0xf9   : > { %v582_v45 = vadd.f32 %v581_v44, %v472_v43  ;;  %v474_v46 = vpop.f32.mrb[1].mxu1  ;;  %v585_v50 = vpop.f32.mrb[2].mxu0 }
  0xfa   : > { %v584_v48 = vadd.f32 %v583_v47, %v474_v46  ;;  %v476_v49 = vpop.f32.mrb[2].mxu1  ;;  %v587_v54 = vpop.f32.mrb[3].mxu0 }
  0xfb   : > { %v624_v51 = vadd.f32 %v607_v39, %v582_v45  ;;  %v586_v52 = vadd.f32 %v585_v50, %v476_v49  ;;  %v478_v53 = vpop.f32.mrb[3].mxu1  ;;  %v696_v45 = vlaneseq }
  0xfc   : > { %v625_v55 = vadd.f32 %v607_v39, %v584_v48  ;;  %v588_v56 = vadd.f32 %v587_v54, %v478_v53 }
  0xfd   : > { %v632_v57 = vmax.f32 %v624_v51, 0.0  ;;  %v626_v58 = vadd.f32 %v612_v41, %v586_v52  ;;  %v697_v49 = vshrl.u32 %v696_v45, 7 }
  0xfe   : > { %v633_v59 = vmax.f32 %v625_v55, 0.0  ;;  %v627_v60 = vadd.f32 %v612_v41, %v588_v56  ;;  %v694_v55 = vpop.permute.xlu0 %693 }
  0xff   : > { %v634_v63 = vmax.f32 %v626_v58, 0.0  ;;  %v591_v2 = vpop.f32.mrb[4].mxu0  ;;  %v664_v3 = vmul.f32 %v647_v61, %v632_v57 }
 0x100   : > { %v635_v0 = vmax.f32 %v627_v60, 0.0  ;;  %v482_v1 = vpop.f32.mrb[4].mxu1  ;;  %v593_v10 = vpop.f32.mrb[5].mxu0  ;;  %v665_v11 = vmul.f32 %v647_v61, %v633_v59 }
 0x101   : > { %v666_v7 = vmul.f32 %v652_v62, %v634_v63  ;;  %v592_v8 = vadd.f32 %v591_v2, %v482_v1  ;;  %v484_v9 = vpop.f32.mrb[5].mxu1  ;;  %v595_v16 = vpop.f32.mrb[6].mxu0 }
 0x102   : > { %v667_v12 = vmul.f32 %v652_v62, %v635_v0  ;;  %v594_v14 = vadd.f32 %v593_v10, %v484_v9  ;;  %v486_v15 = vpop.f32.mrb[6].mxu1  ;;  %v597_v25 = vpop.f32.mrb[7].mxu0  ;;  %v714_v9 = vunpack.c.l.bf16 %v1078_v4  ;;  %v716_v10 = vunpack.c.l.bf16 %v1080_v5 }
 0x103   : > { %v672_v17 = vadd.f32 %v666_v7, %v664_v3  ;;  %v628_v20 = vadd.f32 %v617_v40, %v592_v8  ;;  %v596_v21 = vadd.f32 %v595_v16, %v486_v15  ;;  %v488_v24 = vpop.f32.mrb[7].mxu1  ;;  %v724_v15 = vunpack.c.l.bf16 %v1111_v19 }
 0x104   : > { %v681_v26 = vadd.f32 %v667_v12, %v665_v11  ;;  %v629_v27 = vadd.f32 %v617_v40, %v594_v14  ;;  %v598_v28 = vadd.f32 %v597_v25, %v488_v24  ;;  %v718_v11 = vunpack.c.l.bf16 %v1087_v6 }
 0x105   : > { %v636_v29 = vmax.f32 %v628_v20, 0.0  ;;  %v630_v30 = vadd.f32 %v622_v42, %v596_v21  ;;  %v720_v12 = vunpack.c.l.bf16 %v1101_v13  ;;  %v722_v14 = vunpack.c.l.bf16 %v1109_v18 }
 0x106   : > { %v637_v32 = vmax.f32 %v629_v27, 0.0  ;;  %v631_v33 = vadd.f32 %v622_v42, %v598_v28  ;;  %v698_v42 = vsub.s32 0, %v697_v49  ;;  %v726_v16 = vunpack.c.l.bf16 %v1116_v22 }
 0x107   : > { %v668_v34 = vmul.f32 %v657_v31, %v636_v29  ;;  %v638_v35 = vmax.f32 %v630_v30, 0.0  ;;  %v715_v20 = vunpack.c.h.bf16 %v1078_v4  ;;  %v717_v21 = vunpack.c.h.bf16 %v1080_v5 }
 0x108   : > { %v669_v37 = vmul.f32 %v657_v31, %v637_v32  ;;  %v639_v38 = vmax.f32 %v631_v33, 0.0  ;;  %v699_v59 = vrot.slane %v694_v55, %v698_v42  ;;  %v719_v24 = vunpack.c.h.bf16 %v1087_v6 }
 0x109   : > { %v673_v39 = vadd.f32 %v672_v17, %v668_v34  ;;  %v670_v41 = vmul.f32 %v662_v36, %v638_v35  ;;  %v728_v17 = vunpack.c.l.bf16 %v1118_v23  ;;  %v721_v25 = vunpack.c.h.bf16 %v1101_v13 }
 0x10a   : > { %v682_v43 = vadd.f32 %v681_v26, %v669_v37  ;;  %v671_v44 = vmul.f32 %v662_v36, %v639_v38  ;;  %v723_v27 = vunpack.c.h.bf16 %v1109_v18  ;;  %v725_v4 = vunpack.c.h.bf16 %v1111_v19 }
 0x10b   : > { %v674_v46 = vadd.f32 %v673_v39, %v670_v41  ;;  %v727_v5 = vunpack.c.h.bf16 %v1116_v22  ;;  %v729_v6 = vunpack.c.h.bf16 %v1118_v23 }
 0x10c   : > { %v683_v47 = vadd.f32 %v682_v43, %v671_v44 }
 0x10d   : > { %v675_v48 = vrot.slane %v674_v46, 4 }
 0x10e   : > { %v684_v40 = vrot.slane %v683_v47, 4 }
 0x10f   : > { %v676_v50 = vadd.f32 %v675_v48, %v674_v46 }
 0x110   : > { %v685_v51 = vadd.f32 %v684_v40, %v683_v47 }
 0x111   : > { %v677_v52 = vrot.slane %v676_v50, 2 }
 0x112   : > { %v686_v53 = vrot.slane %v685_v51, 2 }
 0x113   : > { %v678_v54 = vadd.f32 %v677_v52, %v676_v50 }
 0x114   : > { %v687_v56 = vadd.f32 %v686_v53, %v685_v51 }
 0x115   : > { %v679_v57 = vrot.slane %v678_v54, 1 }
 0x116   : > { %v688_v58 = vrot.slane %v687_v56, 1 }
 0x117   : > { %v680_v60 = vadd.f32 %v679_v57, %v678_v54 }
 0x118   : > { %v689_v61 = vadd.f32 %v688_v58, %v687_v56 }
 0x119   : > { %v700_v62 = vadd.f32 %v699_v59, %v680_v60 }
 0x11a   : > { %v701_v63 = vadd.f32 %v699_v59, %v689_v61 }
 0x11b   : > { %v902_v0 = vmul.f32 -1.442695, %v700_v62 }
 0x11c   : > { %v903_v1 = vmul.f32 -1.442695, %v701_v63 }
 0x11d   : > { %968 = vpow2.f32 %v902_v0 }
 0x11e   : > { %970 = vpow2.f32 %v903_v1 }
 0x127   : > { %v969_v2 = vpop.eup %968 }
 0x128   : > { %v971_v3 = vpop.eup %970  ;;  %v708_v7 = vadd.f32 1.0, %v969_v2 }
 0x129   : > { %v709_v8 = vadd.f32 1.0, %v971_v3 }
 0x12a   : > { %972 = vrcp.f32 %v708_v7 }
 0x12b   : > { %974 = vrcp.f32 %v709_v8 }
 0x134   : > { %v973_v26 = vpop.eup %972 }
 0x135   : > { %v975_v28 = vpop.eup %974  ;;  %v730_v13 = vmul.f32 %v973_v26, %v714_v9  ;;  %v732_v29 = vmul.f32 %v973_v26, %v716_v10  ;;  %v734_v30 = vmul.f32 %v973_v26, %v718_v11  ;;  %v736_v31 = vmul.f32 %v973_v26, %v720_v12 }
 0x136   : > { %v738_v32 = vmul.f32 %v973_v26, %v722_v14  ;;  %v740_v33 = vmul.f32 %v973_v26, %v724_v15  ;;  %v742_v34 = vmul.f32 %v973_v26, %v726_v16  ;;  %v744_v18 = vmul.f32 %v973_v26, %v728_v17 }
 0x137   : > { %746 = vst [vmem:[%s1171_s19] sm:$0xff] %v730_v13  ;;  %748 = vst [vmem:[%s1171_s19 + $0x10] sm:$0xff] %v732_v29  ;;  %v731_v19 = vmul.f32 %v975_v28, %v715_v20  ;;  %v733_v22 = vmul.f32 %v975_v28, %v717_v21  ;;  %v735_v23 = vmul.f32 %v975_v28, %v719_v24 }
 0x138   : > { %750 = vst [vmem:[%s1171_s19 + $0x20] sm:$0xff] %v734_v30  ;;  %752 = vst [vmem:[%s1171_s19 + $0x30] sm:$0xff] %v736_v31  ;;  %v737_v35 = vmul.f32 %v975_v28, %v721_v25  ;;  %v739_v36 = vmul.f32 %v975_v28, %v723_v27  ;;  %v741_v37 = vmul.f32 %v975_v28, %v725_v4 }
 0x139   : > { %754 = vst [vmem:[%s1171_s19 + $0x40] sm:$0xff] %v738_v32  ;;  %756 = vst [vmem:[%s1171_s19 + $0x50] sm:$0xff] %v740_v33  ;;  %v743_v38 = vmul.f32 %v975_v28, %v727_v5  ;;  %v745_v39 = vmul.f32 %v975_v28, %v729_v6 }
 0x13a   : > { %758 = vst [vmem:[%s1171_s19 + $0x60] sm:$0xff] %v742_v34  ;;  %760 = vst [vmem:[%s1171_s19 + $0x70] sm:$0xff] %v744_v18 }
 0x13b   : > { %747 = vst [vmem:[%s1171_s19 + $0x8] sm:$0xff] %v731_v19  ;;  %749 = vst [vmem:[%s1171_s19 + $0x18] sm:$0xff] %v733_v22 }
 0x13c   : > { %751 = vst [vmem:[%s1171_s19 + $0x28] sm:$0xff] %v735_v23  ;;  %753 = vst [vmem:[%s1171_s19 + $0x38] sm:$0xff] %v737_v35 }
 0x13d   : > { %755 = vst [vmem:[%s1171_s19 + $0x48] sm:$0xff] %v739_v36  ;;  %757 = vst [vmem:[%s1171_s19 + $0x58] sm:$0xff] %v741_v37 }
 0x13e   : > { %759 = vst [vmem:[%s1171_s19 + $0x68] sm:$0xff] %v743_v38  ;;  %761 = vst [vmem:[%s1171_s19 + $0x78] sm:$0xff] %v745_v39 }
 0x13f PF: > { %s19_s28 = sadd.s32 1, %s998_s28   ;;  %s1210_s26 = smov %s994_s27 }
 0x140   : > { %p16_p5 = scmp.ge.s32.totalorder %s19_s28, 4   ;;  %s1211_s27 = smov %s1213_s6 }
 0x142   :  { %18 = sbr.rel (!%p16_p5) target bundleno = 3 (0x3), region = 81 }

</bundles_post_ra>
